<compile_context>
chip_gen: v6e
topology: v6e:2x2x1
jax: 0.10.0
libtpu: 0.0.40
codegen_flags: <defaults>
</compile_context>

<pallas_src>
import functools

import jax
import jax.numpy as jnp
from jax.experimental import pallas as pl
from jax.experimental.pallas import tpu as pltpu


# ----------------------------- Pallas kernel ------------------------------ #
def model5_mp_kernel(src_ref, dst_ref, dstcol_ref, eattr_ref, node_ref,
                     wms_ref, wmd_ref, wme_ref, bm_ref,
                     out_ref, lhs_sc, rhs_sc, *, mxu_dtype):
    f32 = jnp.float32
    NP = node_ref.shape[1]            # padded node count (lane axis, mult of 128)
    TE = src_ref.shape[1]             # edge-tile size (lane axis, mult of 128)

    # ---- once per core-chunk: stacked LHS [H, 2*NP+DeP] and accumulator init.
    @pl.when(pl.program_id(1) == 0)
    def _init():
        node_t = node_ref[...]                                      # [D, NP] f32
        lhs_sc[:, 0:NP] = jnp.dot(
            wms_ref[...], node_t, preferred_element_type=f32).astype(mxu_dtype)
        lhs_sc[:, NP:2 * NP] = jnp.dot(
            wmd_ref[...], node_t, preferred_element_type=f32).astype(mxu_dtype)
        lhs_sc[:, 2 * NP:] = wme_ref[...]           # Wm_e^T, already mxu_dtype
        out_ref[...] = jnp.zeros_like(out_ref)

    # ---- per edge tile: fused message matmul --------------------------------
    src_row = src_ref[...]                                          # [1, TE]
    dst_row = dst_ref[...]                                          # [1, TE]
    ids2 = jax.lax.broadcasted_iota(jnp.int32, (2 * NP, TE), 0)
    # Combined one-hot: rows [0,NP) select P_src columns, rows [NP,2NP) P_dst.
    # Padded edges (index -1) either match nothing or a zero-padded column, and
    # their messages are discarded by the all-zero scatter one-hot row below.
    oh_comb = jnp.logical_or(ids2 == src_row, ids2 == dst_row + NP)
    rhs_sc[0:2 * NP, :] = oh_comb.astype(mxu_dtype)
    rhs_sc[2 * NP:, :] = eattr_ref[...]             # edge_attr^T tile (mxu_dtype)

    fused = jnp.dot(lhs_sc[...], rhs_sc[...],
                    preferred_element_type=f32)                     # [H, TE]
    msg = jnp.maximum(fused + bm_ref[...], 0.0)     # bias + ReLU in f32 (VPU)

    # ---- scatter-add onto destination nodes: plain MXU matmul ---------------
    node_ids_lane = jax.lax.broadcasted_iota(jnp.int32, (TE, NP), 1)
    oh_dst = (node_ids_lane == dstcol_ref[...]).astype(mxu_dtype)   # [TE, NP]
    out_ref[...] += jnp.dot(msg.astype(mxu_dtype), oh_dst,
                            preferred_element_type=f32)             # [H, NP]


# ------------------------------ wrapper ------------------------------------ #
def _round_up(x, m):
    return ((x + m - 1) // m) * m


def _vmem_limit_bytes():
    # Per-generation scoped-VMEM budget: don't cap at 32 MiB on v5e/v6e
    # (128 MiB physical), stay well under v7x's 64 MiB per TensorCore.
    try:
        phys = int(pltpu.get_tpu_info().vmem_capacity_bytes)
    except Exception:
        phys = 128 * 1024 * 1024
    return int(max(32 * 1024 * 1024, min(phys * 3 // 4, 96 * 1024 * 1024)))


def model5_forward(node_attr, edge_attr, edge_index, batch, params, num_graphs,
                   *, edge_tile=512, num_core_chunks=2,
                   mxu_dtype=jnp.bfloat16):
    """node_attr [N,D] f32, edge_attr [E,De] f32, edge_index [2,E] int,
    batch [N] int (graph id per node). Returns [num_graphs, 1] f32."""
    f32 = jnp.float32
    N, D = node_attr.shape
    E, De = edge_attr.shape
    H = params["Wm_src"].shape[1]
    G = int(num_graphs)

    NP = _round_up(max(N, 1), 128)          # nodes on the lane axis
    DeP = _round_up(De, 8)                  # edge-attr rows (sublane axis)
    K = 2 * NP + DeP                        # fused contraction length

    if E == 0:
        hT = jnp.zeros((H, N), f32)         # guard: no edges -> zero aggregation
    else:
        vmem_limit = _vmem_limit_bytes()
        itemsize = jnp.dtype(mxu_dtype).itemsize
        # Size TE against the [K, TE] fused-RHS scratch (the big per-tile
        # intermediate): keep it within ~1/3 of the scoped budget.  This
        # automatically halves TE on v7x relative to v5e/v6e.
        te_cap = max(128, ((vmem_limit // 3) // (K * itemsize)) // 128 * 128)
        TE = max(128, min((int(edge_tile) // 128) * 128, te_cap))

        NC = max(1, int(num_core_chunks))   # per-core chunks ("parallel" axis)
        chunk = NC * TE
        E_pad = _round_up(E, chunk)
        TPC = E_pad // chunk                # edge tiles per chunk

        # ---- lane-dense, transposed operands (layout plumbing in XLA) -------
        node_t = jnp.pad(node_attr.astype(f32), ((0, NP - N), (0, 0))).T   # [D,NP]
        ea = jnp.pad(edge_attr.astype(f32), ((0, E_pad - E), (0, DeP - De)))
        eattr_t = ea.T.astype(mxu_dtype)                                   # [DeP,Epad]
        eidx = jnp.pad(edge_index.astype(jnp.int32), ((0, 0), (0, E_pad - E)),
                       constant_values=-1)
        src_row = eidx[0].reshape(1, E_pad)
        dst_row = eidx[1].reshape(1, E_pad)
        dst_col = eidx[1].reshape(E_pad, 1)   # scatter one-hot needs dst on sublanes
        wms_t = params["Wm_src"].astype(f32).T                             # [H,D]
        wmd_t = params["Wm_dst"].astype(f32).T                             # [H,D]
        wme_t = jnp.pad(params["Wm_e"].astype(f32),
                        ((0, DeP - De), (0, 0))).T.astype(mxu_dtype)       # [H,DeP]
        bm_col = params["bm"].astype(f32).reshape(H, 1)                    # [H,1]

        etile = lambda c, e: (0, c * TPC + e)
        resident = lambda c, e: (0, 0)

        grid_spec = pltpu.PrefetchScalarGridSpec(
            num_scalar_prefetch=0,
            grid=(NC, TPC),
            in_specs=[
                pl.BlockSpec((1, TE), etile),                          # src row
                pl.BlockSpec((1, TE), etile),                          # dst row
                pl.BlockSpec((TE, 1), lambda c, e: (c * TPC + e, 0)),  # dst col
                pl.BlockSpec((DeP, TE), etile),                        # edge_attr^T
                pl.BlockSpec((D, NP), resident),                       # node_attr^T
                pl.BlockSpec((H, D), resident),                        # Wm_src^T
                pl.BlockSpec((H, D), resident),                        # Wm_dst^T
                pl.BlockSpec((H, DeP), resident),                      # Wm_e^T
                pl.BlockSpec((H, 1), resident),                        # bm
            ],
            out_specs=pl.BlockSpec((None, H, NP), lambda c, e: (c, 0, 0)),
            scratch_shapes=[
                pltpu.VMEM((H, K), mxu_dtype),    # stacked LHS [Psrc|Pdst|WmeT]
                pltpu.VMEM((K, TE), mxu_dtype),   # fused RHS (one-hot + eattr)
            ],
        )

        flops = int(2 * H * K * E_pad             # fused message matmul
                    + 2 * H * NP * E_pad          # scatter matmul
                    + 2 * 2 * H * D * NP * NC)    # node projections (per chunk)
        bytes_accessed = int(
            eattr_t.size * itemsize + wme_t.size * itemsize
            + 4 * (src_row.size + dst_row.size + dst_col.size + node_t.size
                   + wms_t.size + wmd_t.size + bm_col.size + NC * H * NP))

        partials = pl.pallas_call(
            functools.partial(model5_mp_kernel, mxu_dtype=mxu_dtype),
            out_shape=jax.ShapeDtypeStruct((NC, H, NP), f32),
            grid_spec=grid_spec,
            compiler_params=pltpu.CompilerParams(
                dimension_semantics=("parallel", "arbitrary"),
                vmem_limit_bytes=vmem_limit),
            cost_estimate=pl.CostEstimate(flops=flops, transcendentals=0,
                                          bytes_accessed=bytes_accessed),
        )(src_row, dst_row, dst_col, eattr_t, node_t,
          wms_t, wmd_t, wme_t, bm_col)

        hT = jnp.sum(partials, axis=0)[:, :N]     # [H, N] per-node aggregation

    # ---- finalize (lin1 + graph pooling) + tiny lin2/3/4 head in XLA --------
    # (moved out of the kernel per perf review: lane-sparse widths 10/5/5/1,
    #  and it would otherwise serialize behind the edge pipeline / block the
    #  per-core split above; cost is one small [H,N] HBM round-trip.)
    h = jnp.maximum(hT.T @ params["W1"] + params["b1"], 0.0)               # [N, H]
    pool = (batch.astype(jnp.int32)[:, None]
            == jnp.arange(G, dtype=jnp.int32)[None, :]).astype(f32)        # [N, G]
    g = pool.T @ h                                                         # [G, H]
    g = jnp.maximum(g @ params["W2"] + params["b2"], 0.0)
    g = jnp.maximum(g @ params["W3"] + params["b3"], 0.0)
    return g @ params["W4"] + params["b4"]


# --------------------------- pure-JAX reference ---------------------------- #
def model5_reference(node_attr, edge_attr, edge_index, batch, params, num_graphs):
    src, dst = edge_index[0], edge_index[1]
    Wm = jnp.concatenate([params["Wm_src"], params["Wm_dst"], params["Wm_e"]],
                         axis=0)
    msg_in = jnp.concatenate([node_attr[src], node_attr[dst], edge_attr], axis=-1)
    msg = jnp.maximum(msg_in @ Wm + params["bm"], 0.0)
    h = jax.ops.segment_sum(msg, dst, num_segments=node_attr.shape[0])
    h = jnp.maximum(h @ params["W1"] + params["b1"], 0.0)
    g = jax.ops.segment_sum(h, batch, num_segments=num_graphs)
    g = jnp.maximum(g @ params["W2"] + params["b2"], 0.0)
    g = jnp.maximum(g @ params["W3"] + params["b3"], 0.0)
    return g @ params["W4"] + params["b4"]


# ------------------------------- main --------------------------------------- #
if __name__ == "__main__":
    # Small deterministic problem: 2 graphs, 24 nodes, 300 edges.
    N, D, E, De, G, H = 24, 8, 300, 6, 2, 10

    key = jax.random.PRNGKey(0)
    keys = jax.random.split(key, 10)

    node_attr = jax.random.normal(keys[0], (N, D), dtype=jnp.float32)
    edge_attr = jax.random.normal(keys[1], (E, De), dtype=jnp.float32)
    src = jax.random.randint(keys[2], (E,), 0, N, dtype=jnp.int32)
    dst = jax.random.randint(keys[3], (E,), 0, N, dtype=jnp.int32)
    edge_index = jnp.stack([src, dst], axis=0)                         # [2, E]
    batch = jnp.concatenate([jnp.zeros((N // 2,), jnp.int32),
                             jnp.ones((N - N // 2,), jnp.int32)])      # [N]

    def init_linear(k, fan_in, fan_out):
        kw, kb = jax.random.split(k)
        lim = 1.0 / jnp.sqrt(jnp.float32(fan_in))
        W = jax.random.uniform(kw, (fan_in, fan_out), jnp.float32, -lim, lim)
        b = jax.random.uniform(kb, (1, fan_out), jnp.float32, -lim, lim)
        return W, b

    Wm, bm = init_linear(keys[4], 2 * D + De, H)            # MPL_1 message MLP
    params = dict(Wm_src=Wm[:D], Wm_dst=Wm[D:2 * D], Wm_e=Wm[2 * D:], bm=bm)
    params["W1"], params["b1"] = init_linear(keys[5], H, H)     # lin1
    params["W2"], params["b2"] = init_linear(keys[6], H, 5)     # lin2
    params["W3"], params["b3"] = init_linear(keys[7], 5, 5)     # lin3
    params["W4"], params["b4"] = init_linear(keys[8], 5, 1)     # lin4

    ref = model5_reference(node_attr, edge_attr, edge_index, batch, params, G)

    # Exact f32-MXU path: grid (2 core-chunks x 2 edge tiles of 128 edges).
    out_f32 = model5_forward(node_attr, edge_attr, edge_index, batch, params, G,
                             edge_tile=128, mxu_dtype=jnp.float32)
    out_f32 = jax.block_until_ready(out_f32)
    assert out_f32.shape == (G, 1)
    assert jnp.allclose(out_f32, ref, atol=1e-4, rtol=1e-4), (out_f32, ref)

    # Default bf16-MXU-input path (one-hots exact in bf16, f32 accumulation).
    # Loose relative-to-scale check; the f32 path above is the tight one.
    out_bf16 = model5_forward(node_attr, edge_attr, edge_index, batch, params, G,
                              edge_tile=128)
    out_bf16 = jax.block_until_ready(out_bf16)
    rel = float(jnp.max(jnp.abs(out_bf16 - ref))
                / (jnp.max(jnp.abs(ref)) + 1e-6))
    assert rel < 1e-1, (rel, out_bf16, ref)

    print("KERNEL_OK")
</pallas_src>

<mosaic_0001>
module attributes {stable_mosaic.version = 11 : i64} {
  func.func @model5_mp_kernel(%arg0: i32, %arg1: i32, %arg2: memref<1x128xi32, #tpu.memory_space<vmem>>, %arg3: memref<1x128xi32, #tpu.memory_space<vmem>>, %arg4: memref<128x1xi32, #tpu.memory_space<vmem>>, %arg5: memref<8x128xf32, #tpu.memory_space<vmem>>, %arg6: memref<8x128xf32, #tpu.memory_space<vmem>>, %arg7: memref<10x8xf32, #tpu.memory_space<vmem>>, %arg8: memref<10x8xf32, #tpu.memory_space<vmem>>, %arg9: memref<10x8xf32, #tpu.memory_space<vmem>>, %arg10: memref<10x1xf32, #tpu.memory_space<vmem>>, %arg11: memref<1x10x128xf32, #tpu.memory_space<vmem>>, %arg12: memref<10x264xf32, #tpu.memory_space<vmem>>, %arg13: memref<264x128xf32, #tpu.memory_space<vmem>>) attributes {dimension_semantics = [#tpu.dimension_semantics<parallel>, #tpu.dimension_semantics<arbitrary>], iteration_bounds = array<i64: 2, 2>, scalar_prefetch = 0 : i64, scratch_operands = 2 : i64, tpu.core_type = #tpu.core_type<tc>, window_params = [{transform_indices = @transform_0, window_bounds = array<i64: 1, 128>}, {transform_indices = @transform_1, window_bounds = array<i64: 1, 128>}, {transform_indices = @transform_2, window_bounds = array<i64: 128, 1>}, {transform_indices = @transform_3, window_bounds = array<i64: 8, 128>}, {pipeline_mode = #tpu.pipeline_mode<synchronous>, transform_indices = @transform_4, window_bounds = array<i64: 8, 128>}, {pipeline_mode = #tpu.pipeline_mode<synchronous>, transform_indices = @transform_5, window_bounds = array<i64: 10, 8>}, {pipeline_mode = #tpu.pipeline_mode<synchronous>, transform_indices = @transform_6, window_bounds = array<i64: 10, 8>}, {pipeline_mode = #tpu.pipeline_mode<synchronous>, transform_indices = @transform_7, window_bounds = array<i64: 10, 8>}, {pipeline_mode = #tpu.pipeline_mode<synchronous>, transform_indices = @transform_8, window_bounds = array<i64: 10, 1>}, {transform_indices = @transform_9, window_bounds = array<i64: 1, 10, 128>}]} {
    %c0_i32 = arith.constant 0 : i32
    %0 = arith.cmpi eq, %arg1, %c0_i32 : i32
    %1 = arith.extui %0 : i1 to i32
    %c0_i32_0 = arith.constant 0 : i32
    %2 = arith.cmpi ne, %1, %c0_i32_0 : i32
    scf.if %2 {
      %c0_25 = arith.constant 0 : index
      %c0_26 = arith.constant 0 : index
      %39 = vector.load %arg6[%c0_25, %c0_26] : memref<8x128xf32, #tpu.memory_space<vmem>>, vector<8x128xf32>
      %c0_27 = arith.constant 0 : index
      %c0_28 = arith.constant 0 : index
      %40 = vector.load %arg7[%c0_27, %c0_28] : memref<10x8xf32, #tpu.memory_space<vmem>>, vector<10x8xf32>
      %cst_29 = arith.constant dense<0.000000e+00> : vector<10x128xf32>
      %41 = tpu.matmul %40, %39, %cst_29 {dimension_numbers = #tpu.dot_dimension_numbers<[1], [0], [0], [1], [0, 0, 1, 1], [], []>} : vector<10x8xf32>, vector<8x128xf32>, vector<10x128xf32> -> vector<10x128xf32>
      %c0_30 = arith.constant 0 : index
      %c0_31 = arith.constant 0 : index
      %42 = vector.load %arg12[%c0_30, %c0_31] : memref<10x264xf32, #tpu.memory_space<vmem>>, vector<10x128xf32>
      tpu.vector_store %arg12[%c0_30, %c0_31], %41 {strides = array<i32>} : memref<10x264xf32, #tpu.memory_space<vmem>>, vector<10x128xf32>,
      %c0_32 = arith.constant 0 : index
      %c0_33 = arith.constant 0 : index
      %43 = vector.load %arg8[%c0_32, %c0_33] : memref<10x8xf32, #tpu.memory_space<vmem>>, vector<10x8xf32>
      %cst_34 = arith.constant dense<0.000000e+00> : vector<10x128xf32>
      %44 = tpu.matmul %43, %39, %cst_34 {dimension_numbers = #tpu.dot_dimension_numbers<[1], [0], [0], [1], [0, 0, 1, 1], [], []>} : vector<10x8xf32>, vector<8x128xf32>, vector<10x128xf32> -> vector<10x128xf32>
      %c0_35 = arith.constant 0 : index
      %c128 = arith.constant 128 : index
      %45 = vector.load %arg12[%c0_35, %c128] : memref<10x264xf32, #tpu.memory_space<vmem>>, vector<10x128xf32>
      tpu.vector_store %arg12[%c0_35, %c128], %44 {strides = array<i32>} : memref<10x264xf32, #tpu.memory_space<vmem>>, vector<10x128xf32>,
      %c0_36 = arith.constant 0 : index
      %c0_37 = arith.constant 0 : index
      %46 = vector.load %arg9[%c0_36, %c0_37] : memref<10x8xf32, #tpu.memory_space<vmem>>, vector<10x8xf32>
      %c0_38 = arith.constant 0 : index
      %c256_39 = arith.constant 256 : index
      %47 = vector.load %arg12[%c0_38, %c256_39] : memref<10x264xf32, #tpu.memory_space<vmem>>, vector<10x8xf32>
      tpu.vector_store %arg12[%c0_38, %c256_39], %46 {strides = array<i32>} : memref<10x264xf32, #tpu.memory_space<vmem>>, vector<10x8xf32>,
      %cst_40 = arith.constant 0.000000e+00 : f32
      %48 = vector.broadcast %cst_40 : f32 to vector<10x128xf32>
      %c0_41 = arith.constant 0 : index
      %c0_42 = arith.constant 0 : index
      %c0_43 = arith.constant 0 : index
      %49 = vector.load %arg11[%c0_41, %c0_42, %c0_43] : memref<1x10x128xf32, #tpu.memory_space<vmem>>, vector<1x10x128xf32>
      %50 = vector.shape_cast %49 : vector<1x10x128xf32> to vector<10x128xf32>
      %51 = vector.shape_cast %48 : vector<10x128xf32> to vector<1x10x128xf32>
      tpu.vector_store %arg11[%c0_41, %c0_42, %c0_43], %51 {strides = array<i32>} : memref<1x10x128xf32, #tpu.memory_space<vmem>>, vector<1x10x128xf32>,
    } else {
    }
    %c0 = arith.constant 0 : index
    %c0_1 = arith.constant 0 : index
    %3 = vector.load %arg2[%c0, %c0_1] : memref<1x128xi32, #tpu.memory_space<vmem>>, vector<1x128xi32>
    %c0_2 = arith.constant 0 : index
    %c0_3 = arith.constant 0 : index
    %4 = vector.load %arg3[%c0_2, %c0_3] : memref<1x128xi32, #tpu.memory_space<vmem>>, vector<1x128xi32>
    %5 = tpu.iota {dimensions = array<i32: 0>} : vector<256x128xi32>
    %6 = vector.broadcast %3 : vector<1x128xi32> to vector<256x128xi32>
    %7 = arith.cmpi eq, %5, %6 : vector<256x128xi32>
    %c128_i32 = arith.constant 128 : i32
    %8 = vector.broadcast %c128_i32 : i32 to vector<1x128xi32>
    %9 = arith.addi %4, %8 : vector<1x128xi32>
    %10 = vector.broadcast %9 : vector<1x128xi32> to vector<256x128xi32>
    %11 = arith.cmpi eq, %5, %10 : vector<256x128xi32>
    %12 = arith.ori %7, %11 : vector<256x128xi1>
    %13 = arith.extui %12 : vector<256x128xi1> to vector<256x128xi32>
    %14 = arith.sitofp %13 : vector<256x128xi32> to vector<256x128xf32>
    %c0_4 = arith.constant 0 : index
    %c0_5 = arith.constant 0 : index
    %15 = vector.load %arg13[%c0_4, %c0_5] : memref<264x128xf32, #tpu.memory_space<vmem>>, vector<256x128xf32>
    tpu.vector_store %arg13[%c0_4, %c0_5], %14 {strides = array<i32>} : memref<264x128xf32, #tpu.memory_space<vmem>>, vector<256x128xf32>,
    %c0_6 = arith.constant 0 : index
    %c0_7 = arith.constant 0 : index
    %16 = vector.load %arg5[%c0_6, %c0_7] : memref<8x128xf32, #tpu.memory_space<vmem>>, vector<8x128xf32>
    %c256 = arith.constant 256 : index
    %c0_8 = arith.constant 0 : index
    %17 = vector.load %arg13[%c256, %c0_8] : memref<264x128xf32, #tpu.memory_space<vmem>>, vector<8x128xf32>
    tpu.vector_store %arg13[%c256, %c0_8], %16 {strides = array<i32>} : memref<264x128xf32, #tpu.memory_space<vmem>>, vector<8x128xf32>,
    %c0_9 = arith.constant 0 : index
    %c0_10 = arith.constant 0 : index
    %18 = vector.load %arg12[%c0_9, %c0_10] : memref<10x264xf32, #tpu.memory_space<vmem>>, vector<10x264xf32>
    %c0_11 = arith.constant 0 : index
    %c0_12 = arith.constant 0 : index
    %19 = vector.load %arg13[%c0_11, %c0_12] : memref<264x128xf32, #tpu.memory_space<vmem>>, vector<264x128xf32>
    %cst = arith.constant dense<0.000000e+00> : vector<10x128xf32>
    %20 = tpu.matmul %18, %19, %cst {dimension_numbers = #tpu.dot_dimension_numbers<[1], [0], [0], [1], [0, 0, 1, 1], [], []>} : vector<10x264xf32>, vector<264x128xf32>, vector<10x128xf32> -> vector<10x128xf32>
    %c0_13 = arith.constant 0 : index
    %c0_14 = arith.constant 0 : index
    %21 = vector.load %arg10[%c0_13, %c0_14] : memref<10x1xf32, #tpu.memory_space<vmem>>, vector<10x1xf32>
    %22 = vector.broadcast %21 : vector<10x1xf32> to vector<10x128xf32>
    %23 = arith.addf %20, %22 : vector<10x128xf32>
    %cst_15 = arith.constant 0.000000e+00 : f32
    %24 = vector.broadcast %cst_15 : f32 to vector<10x128xf32>
    %25 = arith.maximumf %23, %24 : vector<10x128xf32>
    %26 = tpu.iota {dimensions = array<i32: 1>} : vector<128x128xi32>
    %c0_16 = arith.constant 0 : index
    %c0_17 = arith.constant 0 : index
    %27 = vector.load %arg4[%c0_16, %c0_17] : memref<128x1xi32, #tpu.memory_space<vmem>>, vector<128x1xi32>
    %28 = vector.broadcast %27 : vector<128x1xi32> to vector<128x128xi32>
    %29 = arith.cmpi eq, %26, %28 : vector<128x128xi32>
    %30 = arith.extui %29 : vector<128x128xi1> to vector<128x128xi32>
    %31 = arith.sitofp %30 : vector<128x128xi32> to vector<128x128xf32>
    %c0_18 = arith.constant 0 : index
    %c0_19 = arith.constant 0 : index
    %c0_20 = arith.constant 0 : index
    %32 = vector.load %arg11[%c0_18, %c0_19, %c0_20] : memref<1x10x128xf32, #tpu.memory_space<vmem>>, vector<1x10x128xf32>
    %33 = vector.shape_cast %32 : vector<1x10x128xf32> to vector<10x128xf32>
    %cst_21 = arith.constant dense<0.000000e+00> : vector<10x128xf32>
    %34 = tpu.matmul %25, %31, %cst_21 {dimension_numbers = #tpu.dot_dimension_numbers<[1], [0], [0], [1], [0, 0, 1, 1], [], []>} : vector<10x128xf32>, vector<128x128xf32>, vector<10x128xf32> -> vector<10x128xf32>
    %35 = arith.addf %33, %34 : vector<10x128xf32>
    %c0_22 = arith.constant 0 : index
    %c0_23 = arith.constant 0 : index
    %c0_24 = arith.constant 0 : index
    %36 = vector.load %arg11[%c0_22, %c0_23, %c0_24] : memref<1x10x128xf32, #tpu.memory_space<vmem>>, vector<1x10x128xf32>
    %37 = vector.shape_cast %36 : vector<1x10x128xf32> to vector<10x128xf32>
    %38 = vector.shape_cast %35 : vector<10x128xf32> to vector<1x10x128xf32>
    tpu.vector_store %arg11[%c0_22, %c0_23, %c0_24], %38 {strides = array<i32>} : memref<1x10x128xf32, #tpu.memory_space<vmem>>, vector<1x10x128xf32>,
    return
  }
  func.func @transform_0(%arg0: i32, %arg1: i32) -> (i32, i32) {
    %c2_i32 = arith.constant 2 : i32
    %0 = arith.muli %arg0, %c2_i32 : i32
    %1 = arith.addi %0, %arg1 : i32
    %c0_i32 = arith.constant 0 : i32
    %c0_i32_0 = arith.constant 0 : i32
    return %c0_i32, %1 : i32, i32
  }
  func.func @transform_1(%arg0: i32, %arg1: i32) -> (i32, i32) {
    %c2_i32 = arith.constant 2 : i32
    %0 = arith.muli %arg0, %c2_i32 : i32
    %1 = arith.addi %0, %arg1 : i32
    %c0_i32 = arith.constant 0 : i32
    %c0_i32_0 = arith.constant 0 : i32
    return %c0_i32, %1 : i32, i32
  }
  func.func @transform_2(%arg0: i32, %arg1: i32) -> (i32, i32) {
    %c2_i32 = arith.constant 2 : i32
    %0 = arith.muli %arg0, %c2_i32 : i32
    %1 = arith.addi %0, %arg1 : i32
    %c0_i32 = arith.constant 0 : i32
    %c0_i32_0 = arith.constant 0 : i32
    return %1, %c0_i32 : i32, i32
  }
  func.func @transform_3(%arg0: i32, %arg1: i32) -> (i32, i32) {
    %c2_i32 = arith.constant 2 : i32
    %0 = arith.muli %arg0, %c2_i32 : i32
    %1 = arith.addi %0, %arg1 : i32
    %c0_i32 = arith.constant 0 : i32
    %c0_i32_0 = arith.constant 0 : i32
    return %c0_i32, %1 : i32, i32
  }
  func.func @transform_4(%arg0: i32, %arg1: i32) -> (i32, i32) {
    %c0_i32 = arith.constant 0 : i32
    %c0_i32_0 = arith.constant 0 : i32
    %c0_i32_1 = arith.constant 0 : i32
    return %c0_i32, %c0_i32_0 : i32, i32
  }
  func.func @transform_5(%arg0: i32, %arg1: i32) -> (i32, i32) {
    %c0_i32 = arith.constant 0 : i32
    %c0_i32_0 = arith.constant 0 : i32
    %c0_i32_1 = arith.constant 0 : i32
    return %c0_i32, %c0_i32_0 : i32, i32
  }
  func.func @transform_6(%arg0: i32, %arg1: i32) -> (i32, i32) {
    %c0_i32 = arith.constant 0 : i32
    %c0_i32_0 = arith.constant 0 : i32
    %c0_i32_1 = arith.constant 0 : i32
    return %c0_i32, %c0_i32_0 : i32, i32
  }
  func.func @transform_7(%arg0: i32, %arg1: i32) -> (i32, i32) {
    %c0_i32 = arith.constant 0 : i32
    %c0_i32_0 = arith.constant 0 : i32
    %c0_i32_1 = arith.constant 0 : i32
    return %c0_i32, %c0_i32_0 : i32, i32
  }
  func.func @transform_8(%arg0: i32, %arg1: i32) -> (i32, i32) {
    %c0_i32 = arith.constant 0 : i32
    %c0_i32_0 = arith.constant 0 : i32
    %c0_i32_1 = arith.constant 0 : i32
    return %c0_i32, %c0_i32_0 : i32, i32
  }
  func.func @transform_9(%arg0: i32, %arg1: i32) -> (i32, i32, i32) {
    %c0_i32 = arith.constant 0 : i32
    %c0_i32_0 = arith.constant 0 : i32
    %c0_i32_1 = arith.constant 0 : i32
    return %arg0, %c0_i32, %c0_i32_0 : i32, i32, i32
  }
}

</mosaic_0001>

<bundles_post_ra>
// kernel: tpu_custom_call.1
= control target key start
LH: loop header
LB: loop body
LE: loop exit
PB: predicated region body
PF: predicated region fallthrough
CT: control target
= control target key end

     0   :  { %s1752_s30 = smov 0   ;;  %s1754_s10 = smov 0   ;;  %s2180_s0 = inlined_call_operand.vmem [shape: s32[1,512], index: 0, kind: input, shape index: {}]   ;;  %s2181_s1 = inlined_call_operand.vmem [shape: s32[1,512], index: 1, kind: input, shape index: {}]   ;;  %s2182_s2 = inlined_call_operand.vmem [shape: s32[512,1], index: 2, kind: input, shape index: {}]   ;;  %s2183_s3 = inlined_call_operand.vmem [shape: f32[8,512], index: 3, kind: input, shape index: {}]   ;;  %s2184_s4 = inlined_call_operand.vmem [shape: f32[8,128], index: 4, kind: input, shape index: {}]   ;;  %s2185_s5 = inlined_call_operand.vmem [shape: f32[10,8], index: 5, kind: input, shape index: {}]   ;;  %s2186_s6 = inlined_call_operand.vmem [shape: f32[10,8], index: 6, kind: input, shape index: {}]   ;;  %s2187_s7 = inlined_call_operand.vmem [shape: f32[10,8], index: 7, kind: input, shape index: {}]   ;;  %s2188_s8 = inlined_call_operand.vmem [shape: f32[10,1], index: 8, kind: input, shape index: {}]   ;;  %s2189_s9 = inlined_call_operand.vmem [shape: f32[2,10,128], index: 9, kind: output, shape index: {}]  }
   0x1   :  { %s1756_s11 = smov 0   ;;  %s1758_s12 = smov 0  }
   0x2   :  { %s1760_s13 = smov 0  }
   0x3 LB: > { %2191 = sst [smem:[#allocation4_spill]] %s1693_s12  ;;  %s28_s14 = sadd.s32 1, %s1689_s11  ;;  %s1697_s13 = sphi %s1760_s13, %s19_s13   ;;  %s1693_s12 = sphi %s1758_s12, %s2197_s12   ;;  %s1689_s11 = sphi %s1756_s11, %s2199_s11   ;;  %s1685_s10 = sphi %s1754_s10, %s2195_s10   ;;  %s1681_s30 = sphi %s1752_s30, %s2198_s30  }
   0x4   : > { %s31_s15 = sadd.s32 1, %s1693_s12  ;;  %p29_p0 = scmp.ge.s32.totalorder %s28_s14, 2 }
   0x5   : > { %p1382_p1 = scmp.ge.s32.totalorder %s1697_s13, 1  ;;  %p357_p2 = scmp.lt.s32.totalorder %s1697_s13, 5 }
   0x6   : > { %s2201_s14 = smov (%p29_p0, %s28_s14), 0  ;;  %s2203_s15 = smov (!%p29_p0, %s31_s15), %s1693_s12 }
   0x7   : > { %2192 = sst [smem:[#allocation5_spill]] %s2201_s14  ;;  %p358_p3 = pnand %p1382_p1, %p357_p2 }
   0x8   : > { %p33_p4 = scmp.ge.s32.totalorder %s2203_s15, 2  ;;  %s1383_s16 = sshll.u32 (!%p358_p3), %s1685_s10, 1 }
   0x9   : > { %361 = sbr.rel (%p358_p3) target bundleno = 671 (0x29f), region = 56  ;;  %s412_s17 = sadd.s32 (!%p358_p3), %s1681_s30, %s1383_s16 }
   0xa   : > { %s2205_s15 = smov (%p33_p4, %s2203_s15), 0  ;;  %p413_p5 = scmp.lt.s32.totalorder (!%p358_p3), %s412_s17, 3 }
   0xb   : > { %2193 = sst [smem:[#allocation6_spill]] %s2205_s15  ;;  %s1386_s18 = sshll.u32 (!%p358_p3), %s412_s17, 4 }
   0xc   : > { %p428_p6 = scmp.lt.s32.totalorder (!%p358_p3), %s1386_s18, 63  ;;  %p443_p7 = scmp.lt.s32.totalorder (!%p358_p3), %s1685_s10, 1 }
   0xd   : > { %p1392_p8 = scmp.ne.s32.totalorder (!%p358_p3), %s1681_s30, 0 }
   0xe   : > { %s2207_s17 = smov (!%p413_p5, %s412_s17), 3  ;;  %s2209_s18 = smov (!%p428_p6, %s1386_s18), 63 }
   0xf   : > { %s422_s24 = scalar_lea.vmem %s2181_s1, %s2207_s17  ;;  %s1387_s25 = sshll.u32 %s2209_s18, 3 }
  0x10   : > { %s1389_s26 = sshll.u32 %s2207_s17, 3  ;;  %s1803_s29 = scalar_lea.vmem %s2182_s2, %s1387_s25 }
  0x11   : > { %s1808_s14 = scalar_lea.vmem %s2183_s3, %s1389_s26  ;;  %s2211_s10 = smov (!%p443_p7, %s1685_s10), 1 }
  0x12   : > { %s1466_s12 = sshll.u32 %s2211_s10, 4  ;;  %451 = sbr.rel (%p1392_p8) target bundleno = 224 (0xe0), region = 60 }
  0x13   : > { %s1814_s21 = scalar_lea.vmem %s2189_s9, %s1466_s12 }
  0x17   : > { %v452_v0 = vld [vmem:[%s2184_s4] sm:$0xff]  ;;  %vm455_vm0 = vcmask 64512   ;;  %v454_v4 = vld [vmem:[%s2185_s5 + $0x8] sm:$0x3]  ;;  %vm627_vm1 = vcmask 58368   ;;  %v1699_v7 = vmov 0.0  }
  0x18   : > { %v453_v1 = vld [vmem:[%s2185_s5] sm:$0xff]  ;;  %1564 = vmatprep.subr.mxu0 %v452_v0  ;;  %1569 = vmatprep.subr.mxu1 %v452_v0  ;;  %v540_v5 = vld [vmem:[%s2186_s6 + $0x8] sm:$0x3]  ;;  %629 = vst [vmem:[%s1814_s21] sm:$0xff] %v1699_v7  ;;  %630 = vst [vmem:[%s1814_s21 + $0x8] sm:$0x3] %v1699_v7 }
  0x19   : > { %v624_v2 = vld [vmem:[%s2187_s7] sm:$0xff]  ;;  %1565 = vmatpush3.msra.mxu0 %v452_v0  ;;  %1566 = vmatprep.mubr.msk.f32.mxu0 %vm455_vm0, %v453_v1  ;;  %v625_v6 = vld [vmem:[%s2187_s7 + $0x8] sm:$0x3] }
  0x1a   : > { %626 = vst.msk [vmem:[#allocation2 + $0x10] sm:$0xff] %vm455_vm0, %v624_v2  ;;  %v539_v3 = vld [vmem:[%s2186_s6] sm:$0xff]  ;;  %1570 = vmatpush3.msra.mxu1 %v452_v0  ;;  %1567 = vmatmul.mubr.msk.f32.vlgmr.msra.gmra.mxu0 %vm455_vm0, %v454_v4 }
  0x1b   : > { %1571 = vmatprep.mubr.msk.f32.mxu1 %vm455_vm0, %v539_v3  ;;  %628 = vst.msk [vmem:[#allocation2 + $0x28] sm:$0x3] %vm627_vm1, %v625_v6 }
  0x1c   : > { %1572 = vmatmul.mubr.msk.f32.vlgmr.msra.gmra.mxu1 %vm455_vm0, %v540_v5 }
  0xda   : > { %v1568_v8 = vpop.f32.mrf.mxu0 }
  0xdb   : > { %538 = vst [vmem:[#allocation2 + $0x18] sm:$0x3] %v1568_v8 }
  0xdc   : > { %v1573_v9 = vpop.f32.mrf.mxu1  ;;  %v528_v10 = vpop.f32.mrf.mxu0 }
  0xdd   : > { %623 = vst [vmem:[#allocation2 + $0x20] sm:$0x3] %v1573_v9  ;;  %537 = vst [vmem:[#allocation2] sm:$0xff] %v528_v10 }
  0xde   : > { %v613_v11 = vpop.f32.mrf.mxu1 }
  0xdf   : > { %622 = vst [vmem:[#allocation2 + $0x8] sm:$0xff] %v613_v11 }
  0xe0 PF: > { %v632_v12 = vld [vmem:[%s422_s24] sm:$0x1]  ;;  %v633_v13 = vlaneseq  ;;  %vm920_vm2 = vcmask 64512   ;;  %v871_v18 = vld [vmem:[#allocation2 + $0x10] sm:$0xff]  ;;  %v874_v19 = vld [vmem:[#allocation2 + $0x28] sm:$0x3]  ;;  %s2194_s15 = scalar_lea.vmem %s2180_s0, %s2207_s17 }
  0xe1   : > { %v867_v15 = vld [vmem:[%s1808_s14] sm:$0xff]  ;;  %v702_v17 = vadd.s32 128, %v632_v12  ;;  %1576 = vmatprep.mubr.msk.f32.mxu1 %vm920_vm2, %v871_v18  ;;  %v1096_v21 = vld [vmem:[%s1803_s29 + $0x78] sm:$0xff]  ;;  %v1094_v22 = vld [vmem:[%s1803_s29 + $0x68] sm:$0xff]  ;;  %v1700_v27 = vmov 0   ;;  %v1701_v36 = vmov 1.0  }
  0xe2   : > { %v1847_v16 = vshrl.u32 %v633_v13, 7  ;;  %1574 = vmatprep.subr.mxu1 %v867_v15  ;;  %v1854_v20 = vld [vmem:[%s2194_s15] ss:$0 sm:$0xff]  ;;  %1657 = vset.pattern.permute.xlu0 %v1700_v27  ;;  %v1095_v31 = vld [vmem:[%s1803_s29 + $0x70] sm:$0xff]  ;;  %v1092_v40 = vld [vmem:[%s1803_s29 + $0x58] sm:$0xff] }
  0xe3   : > { %1575 = vmatpush3.msra.mxu1 %v867_v15  ;;  %1143 = vperm.xlu0 %1657, %v1096_v21   ;;  %v1093_v34 = vld [vmem:[%s1803_s29 + $0x60] sm:$0xff]  ;;  %v1091_v42 = vld [vmem:[%s1803_s29 + $0x50] sm:$0xff]  ;;  %v1090_v48 = vld [vmem:[%s1803_s29 + $0x48] sm:$0xff] }
  0xe4   : > { %v665_v23 = vadd.s32 248, %v1847_v16  ;;  %v705_v24 = vsub.s32 0, %v1847_v16  ;;  %v649_v25 = vadd.s32 120, %v1847_v16  ;;  %v664_v26 = vadd.s32 240, %v1847_v16  ;;  %1577 = vmatmul.mubr.msk.f32.vlgmr.msra.gmra.mxu1 %vm920_vm2, %v874_v19  ;;  %1658 = vset.pattern.permute.xlu1 %v1700_v27  ;;  %v1089_v50 = vld [vmem:[%s1803_s29 + $0x40] sm:$0xff]  ;;  %v1088_v56 = vld [vmem:[%s1803_s29 + $0x38] sm:$0xff] }
  0xe5   : > { %v648_v28 = vadd.s32 112, %v1847_v16  ;;  %v663_v30 = vadd.s32 232, %v1847_v16  ;;  %1137 = vperm.xlu1 %1658, %v1094_v22   ;;  %v647_v32 = vadd.s32 104, %v1847_v16  ;;  %v662_v33 = vadd.s32 224, %v1847_v16  ;;  %v1087_v58 = vld [vmem:[%s1803_s29 + $0x30] sm:$0xff]  ;;  %v1086_v62 = vld [vmem:[%s1803_s29 + $0x28] sm:$0xff] }
  0xe6   : > { %v870_v14 = vld [vmem:[#allocation2 + $0x8] sm:$0xff]  ;;  %vm701_vm3 = vcmp.eq.s32.totalorder %v665_v23, %v1854_v20  ;;  %v1864_v29 = vrot.slane %v702_v17, %v705_v24  ;;  %vm685_vm4 = vcmp.eq.s32.totalorder %v649_v25, %v1854_v20  ;;  %vm700_vm7 = vcmp.eq.s32.totalorder %v664_v26, %v1854_v20  ;;  %v1085_v0 = vld [vmem:[%s1803_s29 + $0x20] sm:$0xff]  ;;  %v1084_v4 = vld [vmem:[%s1803_s29 + $0x18] sm:$0xff] }
  0xe7   : > { %991 = vmatprep.mubr.f32.mxu0 %v870_v14  ;;  %vm684_vm10 = vcmp.eq.s32.totalorder %v648_v28, %v1854_v20  ;;  %v646_v35 = vadd.s32 96, %v1847_v16  ;;  %1140 = vperm.xlu0 %1657, %v1095_v31   ;;  %vm699_vm13 = vcmp.eq.s32.totalorder %v663_v30, %v1854_v20  ;;  %v661_v37 = vadd.s32 216, %v1847_v16  ;;  %v908_v5 = vld [vmem:[%s2188_s8] sm:$0xff]  ;;  %v1083_v6 = vld [vmem:[%s1803_s29 + $0x10] sm:$0xff]  ;;  %v909_v7 = vld [vmem:[%s2188_s8 + $0x8] sm:$0x3] }
  0xe8   : > { %vm738_vm5 = vcmp.eq.s32.totalorder %v665_v23, %v1864_v29  ;;  %vm722_vm6 = vcmp.eq.s32.totalorder %v649_v25, %v1864_v29  ;;  %vm737_vm8 = vcmp.eq.s32.totalorder %v664_v26, %v1864_v29  ;;  %vm721_vm11 = vcmp.eq.s32.totalorder %v648_v28, %v1864_v29  ;;  %v869_v8 = vld [vmem:[#allocation2] sm:$0xff]  ;;  %v1082_v10 = vld [vmem:[%s1803_s29 + $0x8] sm:$0xff]  ;;  %v872_v12 = vld [vmem:[#allocation2 + $0x18] sm:$0x3] }
  0xe9   : > { %vm770_vm9 = vmor %vm701_vm3, %vm738_vm5  ;;  %vm736_vm14 = vcmp.eq.s32.totalorder %v663_v30, %v1864_v29  ;;  %1134 = vperm.xlu1 %1658, %v1093_v34   ;;  %vm683_vm0 = vcmp.eq.s32.totalorder %v647_v32, %v1854_v20  ;;  %vm720_vm1 = vcmp.eq.s32.totalorder %v647_v32, %v1864_v29  ;;  %v645_v38 = vadd.s32 88, %v1847_v16  ;;  %v873_v9 = vld [vmem:[#allocation2 + $0x20] sm:$0x3] }
  0xea   : > { %1505 = vmatprep.subr.msk.mxu0 %vm770_vm9, %v1701_v36  ;;  %vm754_vm12 = vmor %vm685_vm4, %vm722_vm6  ;;  %vm698_vm3 = vcmp.eq.s32.totalorder %v662_v33, %v1854_v20  ;;  %vm735_vm4 = vcmp.eq.s32.totalorder %v662_v33, %v1864_v29  ;;  %v660_v39 = vadd.s32 208, %v1847_v16  ;;  %vm682_vm6 = vcmp.eq.s32.totalorder %v646_v35, %v1854_v20  ;;  %v1081_v11 = vld [vmem:[%s1803_s29] sm:$0xff] }
  0xeb   : > { %1506 = vmatpush3.msk.msra.mxu0 %vm754_vm12, %v1701_v36  ;;  %vm769_vm15 = vmor %vm700_vm7, %vm737_vm8  ;;  %vm719_vm7 = vcmp.eq.s32.totalorder %v646_v35, %v1864_v29  ;;  %v644_v41 = vadd.s32 80, %v1847_v16  ;;  %vm697_vm9 = vcmp.eq.s32.totalorder %v661_v37, %v1854_v20  ;;  %v659_v43 = vadd.s32 200, %v1847_v16  ;;  %1131 = vperm.xlu0 %1657, %v1092_v40  }
  0xec   : > { %1507 = vmatprep.subr.msk.mxu0 %vm769_vm15, %v1701_v36  ;;  %vm753_vm2 = vmor %vm684_vm10, %vm721_vm11  ;;  %vm734_vm10 = vcmp.eq.s32.totalorder %v661_v37, %v1864_v29  ;;  %vm681_vm12 = vcmp.eq.s32.totalorder %v645_v38, %v1854_v20  ;;  %v643_v44 = vadd.s32 72, %v1847_v16  ;;  %vm696_vm15 = vcmp.eq.s32.totalorder %v660_v39, %v1854_v20 }
  0xed   : > { %1508 = vmatpush3.msk.msra.mxu0 %vm753_vm2, %v1701_v36  ;;  %vm768_vm5 = vmor %vm699_vm13, %vm736_vm14  ;;  %vm718_vm13 = vcmp.eq.s32.totalorder %v645_v38, %v1864_v29  ;;  %v658_v45 = vadd.s32 192, %v1847_v16  ;;  %1128 = vperm.xlu1 %1658, %v1091_v42   ;;  %vm680_vm2 = vcmp.eq.s32.totalorder %v644_v41, %v1854_v20  ;;  %v642_v46 = vadd.s32 64, %v1847_v16 }
  0xee   : > { %1509 = vmatprep.subr.msk.mxu0 %vm768_vm5, %v1701_v36  ;;  %vm752_vm8 = vmor %vm683_vm0, %vm720_vm1  ;;  %vm733_vm0 = vcmp.eq.s32.totalorder %v660_v39, %v1864_v29  ;;  %vm695_vm5 = vcmp.eq.s32.totalorder %v659_v43, %v1854_v20  ;;  %v657_v47 = vadd.s32 184, %v1847_v16  ;;  %v641_v49 = vadd.s32 56, %v1847_v16 }
  0xef   : > { %1510 = vmatpush3.msk.msra.mxu0 %vm752_vm8, %v1701_v36  ;;  %vm767_vm11 = vmor %vm698_vm3, %vm735_vm4  ;;  %vm717_vm3 = vcmp.eq.s32.totalorder %v644_v41, %v1864_v29  ;;  %vm679_vm8 = vcmp.eq.s32.totalorder %v643_v44, %v1854_v20  ;;  %v656_v51 = vadd.s32 176, %v1847_v16  ;;  %v640_v52 = vadd.s32 48, %v1847_v16  ;;  %1125 = vperm.xlu0 %1657, %v1090_v48   ;;  %v1193_v48 = vld [vmem:[%s1814_s21] sm:$0xff] }
  0xf0   : > { %1511 = vmatprep.subr.msk.mxu0 %vm767_vm11, %v1701_v36  ;;  %vm751_vm14 = vmor %vm682_vm6, %vm719_vm7  ;;  %vm732_vm6 = vcmp.eq.s32.totalorder %v659_v43, %v1864_v29  ;;  %vm694_vm11 = vcmp.eq.s32.totalorder %v658_v45, %v1854_v20  ;;  %v655_v53 = vadd.s32 168, %v1847_v16  ;;  %v639_v54 = vadd.s32 40, %v1847_v16 }
  0xf1   : > { %1512 = vmatpush3.msk.msra.mxu0 %vm751_vm14, %v1701_v36  ;;  %vm766_vm1 = vmor %vm697_vm9, %vm734_vm10  ;;  %vm716_vm9 = vcmp.eq.s32.totalorder %v643_v44, %v1864_v29  ;;  %vm678_vm14 = vcmp.eq.s32.totalorder %v642_v46, %v1854_v20  ;;  %1122 = vperm.xlu1 %1658, %v1089_v50   ;;  %v654_v55 = vadd.s32 160, %v1847_v16  ;;  %v638_v57 = vadd.s32 32, %v1847_v16 }
  0xf2   : > { %1513 = vmatprep.subr.msk.mxu0 %vm766_vm1, %v1701_v36  ;;  %vm750_vm4 = vmor %vm681_vm12, %vm718_vm13  ;;  %vm731_vm12 = vcmp.eq.s32.totalorder %v658_v45, %v1864_v29  ;;  %vm693_vm1 = vcmp.eq.s32.totalorder %v657_v47, %v1854_v20  ;;  %v653_v59 = vadd.s32 152, %v1847_v16  ;;  %v637_v60 = vadd.s32 24, %v1847_v16 }
  0xf3   : > { %1514 = vmatpush3.msk.msra.mxu0 %vm750_vm4, %v1701_v36  ;;  %vm765_vm7 = vmor %vm696_vm15, %vm733_vm0  ;;  %vm715_vm15 = vcmp.eq.s32.totalorder %v642_v46, %v1864_v29  ;;  %vm677_vm4 = vcmp.eq.s32.totalorder %v641_v49, %v1854_v20  ;;  %1119 = vperm.xlu0 %1657, %v1088_v56   ;;  %v652_v61 = vadd.s32 144, %v1847_v16  ;;  %v636_v63 = vadd.s32 16, %v1847_v16 }
  0xf4   : > { %1515 = vmatprep.subr.msk.mxu0 %vm765_vm7, %v1701_v36  ;;  %vm749_vm10 = vmor %vm680_vm2, %vm717_vm3  ;;  %vm730_vm2 = vcmp.eq.s32.totalorder %v657_v47, %v1864_v29  ;;  %vm692_vm7 = vcmp.eq.s32.totalorder %v656_v51, %v1854_v20  ;;  %v651_v1 = vadd.s32 136, %v1847_v16  ;;  %v635_v2 = vadd.s32 8, %v1847_v16 }
  0xf5   : > { %1516 = vmatpush3.msk.msra.mxu0 %vm749_vm10, %v1701_v36  ;;  %vm764_vm13 = vmor %vm695_vm5, %vm732_vm6  ;;  %vm714_vm5 = vcmp.eq.s32.totalorder %v641_v49, %v1864_v29  ;;  %vm676_vm10 = vcmp.eq.s32.totalorder %v640_v52, %v1854_v20  ;;  %1116 = vperm.xlu1 %1658, %v1087_v58   ;;  %v650_v3 = vadd.s32 128, %v1847_v16  ;;  %v2111_v14 = vand.u32 127, %v633_v13 }
  0xf6   : > { %1517 = vmatprep.subr.msk.mxu0 %vm764_vm13, %v1701_v36  ;;  %vm748_vm0 = vmor %vm679_vm8, %vm716_vm9  ;;  %vm729_vm8 = vcmp.eq.s32.totalorder %v656_v51, %v1864_v29  ;;  %vm691_vm13 = vcmp.eq.s32.totalorder %v655_v53, %v1854_v20 }
  0xf7   : > { %1518 = vmatpush3.msk.msra.mxu0 %vm748_vm0, %v1701_v36  ;;  %vm763_vm3 = vmor %vm694_vm11, %vm731_vm12  ;;  %vm713_vm11 = vcmp.eq.s32.totalorder %v640_v52, %v1864_v29  ;;  %vm675_vm0 = vcmp.eq.s32.totalorder %v639_v54, %v1854_v20  ;;  %1113 = vperm.xlu0 %1657, %v1086_v62  }
  0xf8   : > { %1519 = vmatprep.subr.msk.mxu0 %vm763_vm3, %v1701_v36  ;;  %vm747_vm6 = vmor %vm678_vm14, %vm715_vm15  ;;  %vm728_vm14 = vcmp.eq.s32.totalorder %v655_v53, %v1864_v29  ;;  %vm690_vm3 = vcmp.eq.s32.totalorder %v654_v55, %v1854_v20 }
  0xf9   : > { %1520 = vmatpush3.msk.msra.mxu0 %vm747_vm6, %v1701_v36  ;;  %vm762_vm9 = vmor %vm693_vm1, %vm730_vm2  ;;  %vm712_vm1 = vcmp.eq.s32.totalorder %v639_v54, %v1864_v29  ;;  %vm674_vm6 = vcmp.eq.s32.totalorder %v638_v57, %v1854_v20  ;;  %1110 = vperm.xlu1 %1658, %v1085_v0  }
  0xfa   : > { %1521 = vmatprep.subr.msk.mxu0 %vm762_vm9, %v1701_v36  ;;  %vm746_vm12 = vmor %vm677_vm4, %vm714_vm5  ;;  %vm727_vm4 = vcmp.eq.s32.totalorder %v654_v55, %v1864_v29  ;;  %vm689_vm9 = vcmp.eq.s32.totalorder %v653_v59, %v1854_v20 }
  0xfb   : > { %1522 = vmatpush3.msk.msra.mxu0 %vm746_vm12, %v1701_v36  ;;  %vm761_vm15 = vmor %vm692_vm7, %vm729_vm8  ;;  %vm711_vm7 = vcmp.eq.s32.totalorder %v638_v57, %v1864_v29  ;;  %vm673_vm12 = vcmp.eq.s32.totalorder %v637_v60, %v1854_v20  ;;  %1107 = vperm.xlu0 %1657, %v1084_v4  }
  0xfc   : > { %1523 = vmatprep.subr.msk.mxu0 %vm761_vm15, %v1701_v36  ;;  %vm745_vm2 = vmor %vm676_vm10, %vm713_vm11  ;;  %vm726_vm10 = vcmp.eq.s32.totalorder %v653_v59, %v1864_v29  ;;  %vm688_vm15 = vcmp.eq.s32.totalorder %v652_v61, %v1854_v20 }
  0xfd   : > { %1524 = vmatpush3.msk.msra.mxu0 %vm745_vm2, %v1701_v36  ;;  %vm760_vm5 = vmor %vm691_vm13, %vm728_vm14  ;;  %vm710_vm13 = vcmp.eq.s32.totalorder %v637_v60, %v1864_v29  ;;  %vm672_vm2 = vcmp.eq.s32.totalorder %v636_v63, %v1854_v20  ;;  %912 = vperm.xlu1 %1658, %v908_v5  }
  0xfe   : > { %1525 = vmatprep.subr.msk.mxu0 %vm760_vm5, %v1701_v36  ;;  %vm744_vm8 = vmor %vm675_vm0, %vm712_vm1  ;;  %vm725_vm0 = vcmp.eq.s32.totalorder %v652_v61, %v1864_v29  ;;  %vm687_vm5 = vcmp.eq.s32.totalorder %v651_v1, %v1854_v20 }
  0xff   : > { %1526 = vmatpush3.msk.msra.mxu0 %vm744_vm8, %v1701_v36  ;;  %vm759_vm11 = vmor %vm690_vm3, %vm727_vm4  ;;  %vm709_vm3 = vcmp.eq.s32.totalorder %v636_v63, %v1864_v29  ;;  %vm671_vm8 = vcmp.eq.s32.totalorder %v635_v2, %v1854_v20  ;;  %1104 = vperm.xlu0 %1657, %v1083_v6  }
 0x100   : > { %1527 = vmatprep.subr.msk.mxu0 %vm759_vm11, %v1701_v36  ;;  %vm743_vm14 = vmor %vm674_vm6, %vm711_vm7  ;;  %vm724_vm6 = vcmp.eq.s32.totalorder %v651_v1, %v1864_v29  ;;  %vm686_vm11 = vcmp.eq.s32.totalorder %v650_v3, %v1854_v20 }
 0x101   : > { %1528 = vmatpush3.msk.msra.mxu0 %vm743_vm14, %v1701_v36  ;;  %vm758_vm1 = vmor %vm689_vm9, %vm726_vm10  ;;  %vm708_vm9 = vcmp.eq.s32.totalorder %v635_v2, %v1864_v29  ;;  %vm670_vm14 = vcmp.eq.s32.totalorder %v1847_v16, %v1854_v20  ;;  %917 = vperm.xlu1 %1658, %v909_v7  }
 0x102   : > { %1529 = vmatprep.subr.msk.mxu0 %vm758_vm1, %v1701_v36  ;;  %vm742_vm4 = vmor %vm673_vm12, %vm710_vm13  ;;  %vm723_vm12 = vcmp.eq.s32.totalorder %v650_v3, %v1864_v29 }
 0x103   : > { %1530 = vmatpush3.msk.msra.mxu0 %vm742_vm4, %v1701_v36  ;;  %vm757_vm7 = vmor %vm688_vm15, %vm725_vm0  ;;  %vm707_vm15 = vcmp.eq.s32.totalorder %v1847_v16, %v1864_v29  ;;  %1101 = vperm.xlu0 %1657, %v1082_v10  }
 0x104   : > { %1531 = vmatprep.subr.msk.mxu0 %vm757_vm7, %v1701_v36  ;;  %vm741_vm10 = vmor %vm672_vm2, %vm709_vm3 }
 0x105   : > { %1532 = vmatpush3.msk.msra.mxu0 %vm741_vm10, %v1701_v36  ;;  %vm756_vm13 = vmor %vm687_vm5, %vm724_vm6  ;;  %1098 = vperm.xlu1 %1658, %v1081_v11  }
 0x106   : > { %1533 = vmatprep.subr.msk.mxu0 %vm756_vm13, %v1701_v36  ;;  %vm740_vm0 = vmor %vm671_vm8, %vm708_vm9 }
 0x107   : > { %1534 = vmatpush3.msk.msra.mxu0 %vm740_vm0, %v1701_v36  ;;  %vm755_vm1 = vmor %vm686_vm11, %vm723_vm12 }
 0x108   : > { %1535 = vmatprep.subr.msk.mxu0 %vm755_vm1, %v1701_v36  ;;  %vm739_vm2 = vmor %vm670_vm14, %vm707_vm15 }
 0x109   : > { %1536 = vmatpush3.msk.msra.mxu0 %vm739_vm2, %v1701_v36 }
 0x10a   : > { %992 = vmatmul.mubr.f32.vlgmr.msra.gmra.mxu0 %v869_v8 }
 0x10b   : > { %996 = vmatprep.mubr.f32.mxu0 %v873_v9 }
 0x10e   : > { %997 = vmatmul.mubr.f32.gmra.mxu0 %v872_v12 }
 0x15e   : > { %v1144_v15 = vpop.permute.xlu0 %1143 }
 0x15f   : > { %vm1160_vm3 = vcmp.eq.s32.totalorder %v2111_v14, %v1144_v15 }
 0x160   : > { %v1138_v16 = vpop.permute.xlu1 %1137  ;;  %1579 = vmatprep.subr.msk.mxu1 %vm1160_vm3, %v1701_v36 }
 0x161   : > { %1580 = vmatpush3.msk.msra.mxu1 %vm1160_vm3, %v1701_v36  ;;  %vm1158_vm4 = vcmp.eq.s32.totalorder %v2111_v14, %v1138_v16 }
 0x162   : > { %v1141_v17 = vpop.permute.xlu0 %1140 }
 0x163   : > { %vm1159_vm5 = vcmp.eq.s32.totalorder %v2111_v14, %v1141_v17 }
 0x164   : > { %v1135_v18 = vpop.permute.xlu1 %1134  ;;  %1581 = vmatprep.subr.msk.mxu1 %vm1159_vm5, %v1701_v36 }
 0x165   : > { %vm1157_vm6 = vcmp.eq.s32.totalorder %v2111_v14, %v1135_v18  ;;  %1582 = vmatpush3.msk.msra.mxu1 %vm1159_vm5, %v1701_v36 }
 0x166   : > { %1583 = vmatprep.subr.msk.mxu1 %vm1158_vm4, %v1701_v36  ;;  %v1132_v13 = vpop.permute.xlu0 %1131 }
 0x167   : > { %1584 = vmatpush3.msk.msra.mxu1 %vm1158_vm4, %v1701_v36  ;;  %vm1156_vm7 = vcmp.eq.s32.totalorder %v2111_v14, %v1132_v13 }
 0x168   : > { %1585 = vmatprep.subr.msk.mxu1 %vm1157_vm6, %v1701_v36  ;;  %v1129_v19 = vpop.permute.xlu1 %1128 }
 0x169   : > { %1586 = vmatpush3.msk.msra.mxu1 %vm1157_vm6, %v1701_v36  ;;  %vm1155_vm8 = vcmp.eq.s32.totalorder %v2111_v14, %v1129_v19 }
 0x16a   : > { %1587 = vmatprep.subr.msk.mxu1 %vm1156_vm7, %v1701_v36  ;;  %v1126_v20 = vpop.permute.xlu0 %1125 }
 0x16b   : > { %1588 = vmatpush3.msk.msra.mxu1 %vm1156_vm7, %v1701_v36  ;;  %vm1154_vm9 = vcmp.eq.s32.totalorder %v2111_v14, %v1126_v20 }
 0x16c   : > { %1589 = vmatprep.subr.msk.mxu1 %vm1155_vm8, %v1701_v36  ;;  %v1123_v21 = vpop.permute.xlu1 %1122 }
 0x16d   : > { %1590 = vmatpush3.msk.msra.mxu1 %vm1155_vm8, %v1701_v36  ;;  %vm1153_vm10 = vcmp.eq.s32.totalorder %v2111_v14, %v1123_v21 }
 0x16e   : > { %1591 = vmatprep.subr.msk.mxu1 %vm1154_vm9, %v1701_v36  ;;  %v1120_v22 = vpop.permute.xlu0 %1119 }
 0x16f   : > { %1592 = vmatpush3.msk.msra.mxu1 %vm1154_vm9, %v1701_v36  ;;  %vm1152_vm11 = vcmp.eq.s32.totalorder %v2111_v14, %v1120_v22 }
 0x170   : > { %1593 = vmatprep.subr.msk.mxu1 %vm1153_vm10, %v1701_v36  ;;  %v1117_v23 = vpop.permute.xlu1 %1116 }
 0x171   : > { %1594 = vmatpush3.msk.msra.mxu1 %vm1153_vm10, %v1701_v36  ;;  %vm1151_vm12 = vcmp.eq.s32.totalorder %v2111_v14, %v1117_v23 }
 0x172   : > { %1595 = vmatprep.subr.msk.mxu1 %vm1152_vm11, %v1701_v36  ;;  %v1114_v24 = vpop.permute.xlu0 %1113 }
 0x173   : > { %1596 = vmatpush3.msk.msra.mxu1 %vm1152_vm11, %v1701_v36  ;;  %vm1150_vm13 = vcmp.eq.s32.totalorder %v2111_v14, %v1114_v24 }
 0x174   : > { %1597 = vmatprep.subr.msk.mxu1 %vm1151_vm12, %v1701_v36  ;;  %v1111_v25 = vpop.permute.xlu1 %1110 }
 0x175   : > { %1598 = vmatpush3.msk.msra.mxu1 %vm1151_vm12, %v1701_v36  ;;  %vm1149_vm14 = vcmp.eq.s32.totalorder %v2111_v14, %v1111_v25 }
 0x176   : > { %1599 = vmatprep.subr.msk.mxu1 %vm1150_vm13, %v1701_v36  ;;  %v1108_v26 = vpop.permute.xlu0 %1107 }
 0x177   : > { %1600 = vmatpush3.msk.msra.mxu1 %vm1150_vm13, %v1701_v36  ;;  %vm1148_vm15 = vcmp.eq.s32.totalorder %v2111_v14, %v1108_v26 }
 0x178   : > { %1601 = vmatprep.subr.msk.mxu1 %vm1149_vm14, %v1701_v36  ;;  %v913_v27 = vpop.permute.xlu1 %912 }
 0x179   : > { %1602 = vmatpush3.msk.msra.mxu1 %vm1149_vm14, %v1701_v36 }
 0x17a   : > { %1603 = vmatprep.subr.msk.mxu1 %vm1148_vm15, %v1701_v36  ;;  %v1105_v28 = vpop.permute.xlu0 %1104 }
 0x17b   : > { %1604 = vmatpush3.msk.msra.mxu1 %vm1148_vm15, %v1701_v36  ;;  %vm1147_vm0 = vcmp.eq.s32.totalorder %v2111_v14, %v1105_v28 }
 0x17c   : > { %v918_v29 = vpop.permute.xlu1 %917  ;;  %1605 = vmatprep.subr.msk.mxu1 %vm1147_vm0, %v1701_v36 }
 0x17d   : > { %1606 = vmatpush3.msk.msra.mxu1 %vm1147_vm0, %v1701_v36 }
 0x17e   : > { %v1102_v30 = vpop.permute.xlu0 %1101 }
 0x17f   : > { %vm1146_vm1 = vcmp.eq.s32.totalorder %v2111_v14, %v1102_v30 }
 0x180   : > { %v1099_v31 = vpop.permute.xlu1 %1098  ;;  %1607 = vmatprep.subr.msk.mxu1 %vm1146_vm1, %v1701_v36 }
 0x181   : > { %vm1145_vm2 = vcmp.eq.s32.totalorder %v2111_v14, %v1099_v31  ;;  %1608 = vmatpush3.msk.msra.mxu1 %vm1146_vm1, %v1701_v36 }
 0x182   : > { %1609 = vmatprep.subr.msk.mxu1 %vm1145_vm2, %v1701_v36 }
 0x183   : > { %1610 = vmatpush3.msk.msra.mxu1 %vm1145_vm2, %v1701_v36  ;;  %v1194_v36 = vld [vmem:[%s1814_s21 + $0x8] sm:$0x3] }
 0x1a4   : > { %v1578_v33 = vpop.f32.mrf.mxu1 }
 0x1a6   : > { %v1068_v38 = vpop.f32.mrf.mxu1 }
 0x1ca   : > { %v1537_v32 = vpop.f32.mrf.mxu0 }
 0x1cc   : > { %v1538_v34 = vpop.f32.mrf.mxu0 }
 0x1cd   : > { %v1539_v35 = vadd.f32 %v1538_v34, %v1537_v32 }
 0x1ce   : > { %v1540_v37 = vpop.f32.mrf.mxu0 }
 0x1cf   : > { %v994_v39 = vadd.f32 %v1539_v35, %v913_v27 }
 0x1d0   : > { %v1541_v40 = vpop.f32.mrf.mxu0 }
 0x1d1   : > { %v1542_v41 = vadd.f32 %v1541_v40, %v1540_v37  ;;  %v1069_v42 = vadd.f32 %v1068_v38, %v994_v39 }
 0x1d3   : > { %v999_v43 = vadd.f32 %v1542_v41, %v918_v29  ;;  %v1077_v44 = vmax.f32 %v1069_v42, 0.0 }
 0x1d5   : > { %v1074_v45 = vadd.f32 %v1578_v33, %v999_v43  ;;  %1611 = vmatprep.mubr.f32.mxu1 %v1077_v44 }
 0x1d7   : > { %v1078_v46 = vmax.f32 %v1074_v45, 0.0 }
 0x1d9   : > { %1612 = vmatmul.mubr.f32.vlgmr.msra.gmra.mxu1 %v1078_v46 }
 0x299   : > { %v1613_v47 = vpop.f32.mrf.mxu1 }
 0x29a   : > { %v1271_v49 = vadd.f32 %v1613_v47, %v1194_v36 }
 0x29b   : > { %v1261_v50 = vpop.f32.mrf.mxu1 }
 0x29c   : > { %1273 = vst [vmem:[%s1814_s21 + $0x8] sm:$0x3] %v1271_v49  ;;  %v1270_v51 = vadd.f32 %v1261_v50, %v1193_v48 }
 0x29e   : > { %1272 = vst [vmem:[%s1814_s21] sm:$0xff] %v1270_v51 }
 0x29f PF: > { %s19_s13 = sadd.s32 1, %s1697_s13   ;;  %s2195_s10 = sld [smem:[#allocation4_spill]] }
 0x2a0   : > { %p16_p9 = scmp.ge.s32.totalorder %s19_s13, 6   ;;  %s2196_s29 = sld [smem:[#allocation5_spill]] }
 0x2a1   : > { %s2197_s12 = sld [smem:[#allocation6_spill]]  ;;  %s2198_s30 = smov %s1689_s11 }
 0x2a2   :  { %18 = sbr.rel (!%p16_p9) target bundleno = 3 (0x3), region = 99 }
 0x2a6   : > { %s2199_s11 = smov %s2196_s29 }

</bundles_post_ra>
